<compile_context>
chip_gen: v5e
topology: v5e:2x2
jax: 0.10.0
libtpu: 0.0.40
codegen_flags: <defaults>
</compile_context>

<pallas_src>
import jax
import jax.numpy as jnp
from jax.experimental import pallas as pl
from jax.experimental.pallas import tpu as pltpu


_OUT_ROWS = 8  # x1, y1, x2, y2, score, class_id, mask, pad


def _round_up(n, m):
    return ((n + m - 1) // m) * m


def _cdiv(a, b):
    return -(-a // b)


def _vmem_budget_bytes():
    """Per-generation VMEM budget with headroom (v7x ~48MiB, v5e/v6e ~96MiB)."""
    try:
        cap = int(pltpu.get_tpu_info().vmem_capacity_bytes)
    except Exception:
        cap = 64 * 1024 * 1024            # v7x-safe fallback
    return min(cap * 3 // 4, 96 * 1024 * 1024)


def _choose_anchor_tile(B, C, K, M, itemsize, vmem_budget):
    """Pick the lane (anchor) tile size tm (multiple of 128)."""
    m128 = _round_up(max(M, 1), 128)
    # Aim for >= ~1 MiB input blocks so per-step overhead / DMA fixed cost are
    # amortized (tiny tiles reach only ~30% of HBM roofline, >=1MiB ~85%).
    tm = _round_up(max(512, (1 << 20) // max(1, C * itemsize)), 128)
    # VMEM cap: double-buffered input + output blocks plus in-kernel temporaries.
    bytes_per_lane = (2 * C * itemsize          # x double-buffer
                      + 2 * _OUT_ROWS * 4       # out double-buffer
                      + 4 * (K + 2 * _OUT_ROWS))  # raw + epilogue temps (f32)
    tm_cap = max(128, (vmem_budget // bytes_per_lane) // 128 * 128)
    tm = min(tm, tm_cap, m128)
    # v7x has 2 TensorCores: keep at least 2 parallel grid steps when possible.
    if B * _cdiv(M, tm) < 2 and m128 >= 256:
        tm = max(128, _round_up(_cdiv(m128, 2), 128))
    return tm


def _yolo_decode_kernel(conf_ref, x_ref, w_ref, b_ref, out_ref):
    """One (batch, anchor-tile) grid step, feature-major layout.

    conf_ref: [1, 1]  SMEM confidence threshold
    x_ref:    [C, TM] activations for TM anchors (lanes = anchors)
    w_ref:    [K, C]  decode-folded head weights (rows 0..3 emit xyxy directly)
    b_ref:    [K, 1]  decode-folded head bias
    out_ref:  [8, TM] rows = x1, y1, x2, y2, score, class_id, mask, pad
    """
    x = x_ref[...]                       # [C, TM]
    w = w_ref[...]                       # [K, C]
    b = b_ref[...]                       # [K, 1] f32, broadcasts along lanes

    # 1x1-conv head + xywh->xyxy decode in a single MXU matmul (f32 accumulate).
    raw = jnp.dot(w, x, preferred_element_type=jnp.float32) + b   # [K, TM]

    # Boxes already decoded to xyxy via the folded weights.
    out_ref[0:4, :] = raw[0:4, :]

    conf = raw[4:5, :]                   # [1, TM]
    nc = raw.shape[0] - 5

    # Streaming first-max argmax over class rows, 8 sublanes at a time,
    # keeping only [1, TM]-sized running state live (low vreg pressure).
    run_max = jnp.full(conf.shape, -jnp.inf, dtype=jnp.float32)
    run_idx = jnp.zeros(conf.shape, dtype=jnp.float32)
    _CHUNK = 8
    for c0 in range(0, nc, _CHUNK):
        c1 = min(c0 + _CHUNK, nc)
        rows = raw[5 + c0:5 + c1, :]                               # [<=8, TM]
        rows_max = jnp.max(rows, axis=0, keepdims=True)            # [1, TM]
        iota = jax.lax.broadcasted_iota(jnp.int32, rows.shape, 0) + c0
        rows_idx = jnp.min(jnp.where(rows == rows_max, iota, nc),
                           axis=0, keepdims=True).astype(jnp.float32)
        better = rows_max > run_max          # strict '>' keeps first-max index
        run_idx = jnp.where(better, rows_idx, run_idx)
        run_max = jnp.maximum(run_max, rows_max)

    scores = conf * run_max                                        # [1, TM]
    thresh = conf_ref[0, 0]
    mask = (scores > thresh).astype(jnp.float32)

    # Direct lane-dense row writes (no concatenate temporary).
    out_ref[4:5, :] = scores
    out_ref[5:6, :] = run_idx
    out_ref[6:7, :] = mask
    out_ref[7:8, :] = jnp.zeros_like(scores)


def yolo_decode_pallas(x_ncm, w_dec_t, b_dec_t, conf_arr):
    """x_ncm: [B, C, M] (f32 or bf16), w_dec_t: [K, C], b_dec_t: [K, 1] f32,
    conf_arr: [1, 1] f32.  Returns [B, 8, M] f32 feature-major:
    rows = x1, y1, x2, y2, score, class_id, mask, pad."""
    B, C, M = x_ncm.shape
    K = w_dec_t.shape[0]
    itemsize = jnp.dtype(x_ncm.dtype).itemsize

    vmem_budget = _vmem_budget_bytes()
    tm = _choose_anchor_tile(B, C, K, M, itemsize, vmem_budget)
    grid_m = _cdiv(M, tm)   # ragged last block handled by Pallas write masking

    return pl.pallas_call(
        _yolo_decode_kernel,
        out_shape=jax.ShapeDtypeStruct((B, _OUT_ROWS, M), jnp.float32),
        grid_spec=pltpu.PrefetchScalarGridSpec(
            num_scalar_prefetch=0,
            grid=(B, grid_m),
            in_specs=[
                # conf_thresh scalar in SMEM (runtime value -> no retrace)
                pl.BlockSpec(memory_space=pltpu.MemorySpace.SMEM),
                # batch dim squeezed out; anchors tiled along lanes
                pl.BlockSpec((None, C, tm), lambda bi, mi: (bi, 0, mi)),
                pl.BlockSpec((K, C), lambda bi, mi: (0, 0)),
                pl.BlockSpec((K, 1), lambda bi, mi: (0, 0)),
            ],
            out_specs=pl.BlockSpec((None, _OUT_ROWS, tm),
                                   lambda bi, mi: (bi, 0, mi)),
        ),
        compiler_params=pltpu.CompilerParams(
            dimension_semantics=("parallel", "parallel"),
            vmem_limit_bytes=int(vmem_budget)),
    )(conf_arr, x_ncm, w_dec_t, b_dec_t)


class ModelWrapperPallas:
    """JAX/Pallas equivalent of ModelWrapper with a synthetic 1x1-conv YOLO head.

    The xywh->xyxy decode is folded into the (transposed) head parameters so
    the kernel's matmul emits x1,y1,x2,y2 directly.
    """

    def __init__(self, in_channels, num_classes, conf_thresh=0.25, seed=1):
        self.conf_thresh = float(conf_thresh)
        k = 5 + num_classes
        kw, kb = jax.random.split(jax.random.PRNGKey(seed))
        # deterministic synthetic head parameters
        self.w = jax.random.normal(kw, (in_channels, k), dtype=jnp.float32)
        self.b = jax.random.normal(kb, (1, k), dtype=jnp.float32)

        # Decode-folding matrix D: rows 0..3 map (x, y, w, h) -> (x1, y1, x2, y2)
        d = jnp.eye(k, dtype=jnp.float32)
        d = d.at[0, 2].set(-0.5)                     # x1 = x - 0.5*w
        d = d.at[1, 3].set(-0.5)                     # y1 = y - 0.5*h
        d = d.at[2, 0].set(1.0).at[2, 2].set(0.5)    # x2 = x + 0.5*w
        d = d.at[3, 1].set(1.0).at[3, 3].set(0.5)    # y2 = y + 0.5*h
        self.w_dec_t = d @ self.w.T                  # [K, C]
        self.b_dec_t = d @ self.b.T                  # [K, 1]

        # conf_thresh passed at runtime (SMEM scalar) -> no retrace on change.
        self._conf_arr = jnp.full((1, 1), self.conf_thresh, dtype=jnp.float32)
        self._decode_jit = jax.jit(self._decode_impl)

    def _decode_impl(self, x_nchw, conf_arr):
        B, C, H, W = x_nchw.shape
        m = H * W
        # Native NCHW view [B, C, H*W] -- no NHWC transpose needed.
        if x_nchw.dtype == jnp.bfloat16:
            x_ncm = x_nchw.reshape(B, C, m)          # keep bf16: halves HBM traffic
            w = self.w_dec_t.astype(jnp.bfloat16)
        else:
            x_ncm = x_nchw.reshape(B, C, m).astype(jnp.float32)
            w = self.w_dec_t
        return yolo_decode_pallas(x_ncm, w, self.b_dec_t, conf_arr)

    def decode(self, x_nchw):
        """Feature-major decode [B, 8, M]: x1,y1,x2,y2,score,class_id,mask,pad."""
        return self._decode_jit(x_nchw, self._conf_arr)

    def __call__(self, x_nchw):
        out = self.decode(x_nchw)                    # [B, 8, M], fully jitted
        # Dynamic-shape boolean selection (torch mask + cat) has no static-shape
        # Pallas equivalent; gather only the tiny selected set eagerly.
        keep = out[:, 6, :] > 0.0                    # [B, M]
        b_idx, m_idx = jnp.nonzero(keep)
        if b_idx.size == 0:
            return jnp.zeros((0, 6), dtype=jnp.float32)
        detections = out[b_idx, :6, m_idx]           # [num_det, 6]
        return detections


def _reference_decode(x_flat, w, b, conf_thresh):
    raw = x_flat @ w + b
    xy, wh, conf, cls = raw[:, 0:2], raw[:, 2:4], raw[:, 4:5], raw[:, 5:]
    xmin = xy[:, 0:1] - wh[:, 0:1] / 2
    ymin = xy[:, 1:2] - wh[:, 1:2] / 2
    xmax = xy[:, 0:1] + wh[:, 0:1] / 2
    ymax = xy[:, 1:2] + wh[:, 1:2] / 2
    max_scores = jnp.max(cls, axis=-1, keepdims=True)
    idx = jnp.argmax(cls, axis=-1, keepdims=True).astype(jnp.float32)
    srt = jnp.sort(cls, axis=-1)
    margin = srt[:, -1] - srt[:, -2]                 # top-2 class margin
    scores = conf * max_scores
    boxes = jnp.concatenate([xmin, ymin, xmax, ymax, scores, idx], axis=-1)
    mask = (scores[:, 0] > conf_thresh).astype(jnp.float32)
    return boxes, mask, margin


if __name__ == "__main__":
    B, C, H, W = 2, 4, 16, 16
    num_classes = 3

    key = jax.random.PRNGKey(0)
    x = jax.random.normal(key, (B, C, H, W), dtype=jnp.float32)

    wrapper = ModelWrapperPallas(in_channels=C, num_classes=num_classes,
                                 conf_thresh=0.25, seed=1)

    out = wrapper.decode(x)                          # [B, 8, M] feature-major
    detections = wrapper(x)                          # [num_det, 6]
    jax.block_until_ready((out, detections))

    # ---- Correctness check against a pure-JAX reference (test-only path) ----
    Bm = B * H * W
    boxes = jnp.transpose(out[:, :6, :], (0, 2, 1)).reshape(Bm, 6)
    mask = out[:, 6, :].reshape(Bm)

    # NHWC flatten in the reference matches the kernel's NCHW anchor ordering.
    x_flat = jnp.transpose(x, (0, 2, 3, 1)).reshape(Bm, C)
    ref_boxes, ref_mask, ref_margin = _reference_decode(
        x_flat, wrapper.w, wrapper.b, wrapper.conf_thresh)

    # Coords + score: tolerate MXU-pass rounding differences vs the reference.
    diff = jnp.max(jnp.abs(boxes[:, :5] - ref_boxes[:, :5]))
    assert jnp.allclose(boxes[:, :5], ref_boxes[:, :5], atol=5e-2, rtol=5e-2), (
        float(diff))
    # Class id: exact match wherever the reference top-2 margin is unambiguous.
    clear = ref_margin > 1e-1
    assert bool(jnp.all(jnp.where(clear, boxes[:, 5] == ref_boxes[:, 5], True)))
    # Mask: match except for scores numerically near the threshold.
    borderline = jnp.abs(ref_boxes[:, 4] - wrapper.conf_thresh) < 5e-2
    assert bool(jnp.all(((mask > 0.0) == (ref_mask > 0.0)) | borderline))
    assert detections.ndim == 2 and detections.shape[1] == 6

    print("KERNEL_OK")
</pallas_src>

<mosaic_0001>
module attributes {stable_mosaic.version = 11 : i64} {
  func.func @_yolo_decode_kernel(%arg0: i32, %arg1: i32, %arg2: memref<1x1xf32, #tpu.memory_space<smem>>, %arg3: memref<1x4x256xf32, #tpu.memory_space<vmem>>, %arg4: memref<8x4xf32, #tpu.memory_space<vmem>>, %arg5: memref<8x1xf32, #tpu.memory_space<vmem>>, %arg6: memref<1x8x256xf32, #tpu.memory_space<vmem>>) attributes {dimension_semantics = [#tpu.dimension_semantics<parallel>, #tpu.dimension_semantics<parallel>], iteration_bounds = array<i64: 2, 1>, scalar_prefetch = 0 : i64, scratch_operands = 0 : i64, tpu.core_type = #tpu.core_type<tc>, window_params = [{transform_indices = @transform_0, window_bounds = array<i64: 1, 1>}, {transform_indices = @transform_1, window_bounds = array<i64: 1, 4, 256>}, {pipeline_mode = #tpu.pipeline_mode<synchronous>, transform_indices = @transform_2, window_bounds = array<i64: 8, 4>}, {pipeline_mode = #tpu.pipeline_mode<synchronous>, transform_indices = @transform_3, window_bounds = array<i64: 8, 1>}, {transform_indices = @transform_4, window_bounds = array<i64: 1, 8, 256>}]} {
    %c0 = arith.constant 0 : index
    %c0_0 = arith.constant 0 : index
    %c0_1 = arith.constant 0 : index
    %0 = vector.load %arg3[%c0, %c0_0, %c0_1] : memref<1x4x256xf32, #tpu.memory_space<vmem>>, vector<1x4x256xf32>
    %1 = vector.shape_cast %0 : vector<1x4x256xf32> to vector<4x256xf32>
    %c0_2 = arith.constant 0 : index
    %c0_3 = arith.constant 0 : index
    %2 = vector.load %arg4[%c0_2, %c0_3] : memref<8x4xf32, #tpu.memory_space<vmem>>, vector<8x4xf32>
    %c0_4 = arith.constant 0 : index
    %c0_5 = arith.constant 0 : index
    %3 = vector.load %arg5[%c0_4, %c0_5] : memref<8x1xf32, #tpu.memory_space<vmem>>, vector<8x1xf32>
    %cst = arith.constant dense<0.000000e+00> : vector<8x256xf32>
    %4 = tpu.matmul %2, %1, %cst {dimension_numbers = #tpu.dot_dimension_numbers<[1], [0], [0], [1], [0, 0, 1, 1], [], []>} : vector<8x4xf32>, vector<4x256xf32>, vector<8x256xf32> -> vector<8x256xf32>
    %5 = vector.broadcast %3 : vector<8x1xf32> to vector<8x256xf32>
    %6 = arith.addf %4, %5 : vector<8x256xf32>
    %7 = vector.extract_strided_slice %6 {offsets = [0, 0], sizes = [4, 256], strides = [1, 1]} : vector<8x256xf32> to vector<4x256xf32>
    %c0_6 = arith.constant 0 : index
    %c0_7 = arith.constant 0 : index
    %c0_8 = arith.constant 0 : index
    %8 = vector.load %arg6[%c0_6, %c0_7, %c0_8] : memref<1x8x256xf32, #tpu.memory_space<vmem>>, vector<1x4x256xf32>
    %9 = vector.shape_cast %8 : vector<1x4x256xf32> to vector<4x256xf32>
    %10 = vector.shape_cast %7 : vector<4x256xf32> to vector<1x4x256xf32>
    tpu.vector_store %arg6[%c0_6, %c0_7, %c0_8], %10 {strides = array<i32>} : memref<1x8x256xf32, #tpu.memory_space<vmem>>, vector<1x4x256xf32>,
    %11 = vector.extract_strided_slice %6 {offsets = [4, 0], sizes = [1, 256], strides = [1, 1]} : vector<8x256xf32> to vector<1x256xf32>
    %cst_9 = arith.constant 0xFF800000 : f32
    %12 = vector.broadcast %cst_9 : f32 to vector<1x256xf32>
    %cst_10 = arith.constant 0.000000e+00 : f32
    %13 = vector.broadcast %cst_10 : f32 to vector<1x256xf32>
    %14 = vector.extract_strided_slice %6 {offsets = [5, 0], sizes = [3, 256], strides = [1, 1]} : vector<8x256xf32> to vector<3x256xf32>
    %cst_11 = arith.constant dense<0xFF800000> : vector<256xf32>
    %15 = vector.multi_reduction <maximumf>, %14, %cst_11 [0] : vector<3x256xf32> to vector<256xf32>
    %16 = vector.shape_cast %15 : vector<256xf32> to vector<1x256xf32>
    %17 = tpu.iota {dimensions = array<i32: 0>} : vector<3x256xi32>
    %c0_i32 = arith.constant 0 : i32
    %18 = vector.broadcast %c0_i32 : i32 to vector<3x256xi32>
    %19 = arith.addi %17, %18 : vector<3x256xi32>
    %20 = vector.broadcast %16 : vector<1x256xf32> to vector<3x256xf32>
    %21 = arith.cmpf oeq, %14, %20 : vector<3x256xf32>
    %c3_i32 = arith.constant 3 : i32
    %22 = vector.broadcast %c3_i32 : i32 to vector<3x256xi32>
    %23 = arith.select %21, %19, %22 : vector<3x256xi1>, vector<3x256xi32>
    %cst_12 = arith.constant dense<2147483647> : vector<256xi32>
    %24 = vector.multi_reduction <minsi>, %23, %cst_12 [0] : vector<3x256xi32> to vector<256xi32>
    %25 = vector.shape_cast %24 : vector<256xi32> to vector<1x256xi32>
    %26 = arith.sitofp %25 : vector<1x256xi32> to vector<1x256xf32>
    %27 = arith.cmpf ogt, %16, %12 : vector<1x256xf32>
    %28 = arith.select %27, %26, %13 : vector<1x256xi1>, vector<1x256xf32>
    %29 = arith.maximumf %12, %16 : vector<1x256xf32>
    %30 = arith.mulf %11, %29 : vector<1x256xf32>
    %c0_13 = arith.constant 0 : index
    %c0_14 = arith.constant 0 : index
    %31 = memref.load %arg2[%c0_13, %c0_14] : memref<1x1xf32, #tpu.memory_space<smem>>
    %32 = vector.broadcast %31 : f32 to vector<1x256xf32>
    %33 = arith.cmpf ogt, %30, %32 : vector<1x256xf32>
    %34 = arith.extui %33 : vector<1x256xi1> to vector<1x256xi32>
    %35 = arith.sitofp %34 : vector<1x256xi32> to vector<1x256xf32>
    %c0_15 = arith.constant 0 : index
    %c4 = arith.constant 4 : index
    %c0_16 = arith.constant 0 : index
    %36 = vector.load %arg6[%c0_15, %c4, %c0_16] : memref<1x8x256xf32, #tpu.memory_space<vmem>>, vector<1x1x256xf32>
    %37 = vector.shape_cast %36 : vector<1x1x256xf32> to vector<1x256xf32>
    %38 = vector.shape_cast %30 : vector<1x256xf32> to vector<1x1x256xf32>
    tpu.vector_store %arg6[%c0_15, %c4, %c0_16], %38 {strides = array<i32>} : memref<1x8x256xf32, #tpu.memory_space<vmem>>, vector<1x1x256xf32>,
    %c0_17 = arith.constant 0 : index
    %c5 = arith.constant 5 : index
    %c0_18 = arith.constant 0 : index
    %39 = vector.load %arg6[%c0_17, %c5, %c0_18] : memref<1x8x256xf32, #tpu.memory_space<vmem>>, vector<1x1x256xf32>
    %40 = vector.shape_cast %39 : vector<1x1x256xf32> to vector<1x256xf32>
    %41 = vector.shape_cast %28 : vector<1x256xf32> to vector<1x1x256xf32>
    tpu.vector_store %arg6[%c0_17, %c5, %c0_18], %41 {strides = array<i32>} : memref<1x8x256xf32, #tpu.memory_space<vmem>>, vector<1x1x256xf32>,
    %c0_19 = arith.constant 0 : index
    %c6 = arith.constant 6 : index
    %c0_20 = arith.constant 0 : index
    %42 = vector.load %arg6[%c0_19, %c6, %c0_20] : memref<1x8x256xf32, #tpu.memory_space<vmem>>, vector<1x1x256xf32>
    %43 = vector.shape_cast %42 : vector<1x1x256xf32> to vector<1x256xf32>
    %44 = vector.shape_cast %35 : vector<1x256xf32> to vector<1x1x256xf32>
    tpu.vector_store %arg6[%c0_19, %c6, %c0_20], %44 {strides = array<i32>} : memref<1x8x256xf32, #tpu.memory_space<vmem>>, vector<1x1x256xf32>,
    %cst_21 = arith.constant 0.000000e+00 : f32
    %45 = vector.broadcast %cst_21 : f32 to vector<1x256xf32>
    %c0_22 = arith.constant 0 : index
    %c7 = arith.constant 7 : index
    %c0_23 = arith.constant 0 : index
    %46 = vector.load %arg6[%c0_22, %c7, %c0_23] : memref<1x8x256xf32, #tpu.memory_space<vmem>>, vector<1x1x256xf32>
    %47 = vector.shape_cast %46 : vector<1x1x256xf32> to vector<1x256xf32>
    %48 = vector.shape_cast %45 : vector<1x256xf32> to vector<1x1x256xf32>
    tpu.vector_store %arg6[%c0_22, %c7, %c0_23], %48 {strides = array<i32>} : memref<1x8x256xf32, #tpu.memory_space<vmem>>, vector<1x1x256xf32>,
    return
  }
  func.func @transform_0(%arg0: i32, %arg1: i32) -> (i32, i32) {
    %c0_i32 = arith.constant 0 : i32
    %c0_i32_0 = arith.constant 0 : i32
    %c0_i32_1 = arith.constant 0 : i32
    return %c0_i32, %c0_i32_0 : i32, i32
  }
  func.func @transform_1(%arg0: i32, %arg1: i32) -> (i32, i32, i32) {
    %c0_i32 = arith.constant 0 : i32
    %c0_i32_0 = arith.constant 0 : i32
    return %arg0, %c0_i32, %arg1 : i32, i32, i32
  }
  func.func @transform_2(%arg0: i32, %arg1: i32) -> (i32, i32) {
    %c0_i32 = arith.constant 0 : i32
    %c0_i32_0 = arith.constant 0 : i32
    %c0_i32_1 = arith.constant 0 : i32
    return %c0_i32, %c0_i32_0 : i32, i32
  }
  func.func @transform_3(%arg0: i32, %arg1: i32) -> (i32, i32) {
    %c0_i32 = arith.constant 0 : i32
    %c0_i32_0 = arith.constant 0 : i32
    %c0_i32_1 = arith.constant 0 : i32
    return %c0_i32, %c0_i32_0 : i32, i32
  }
  func.func @transform_4(%arg0: i32, %arg1: i32) -> (i32, i32, i32) {
    %c0_i32 = arith.constant 0 : i32
    %c0_i32_0 = arith.constant 0 : i32
    return %arg0, %c0_i32, %arg1 : i32, i32, i32
  }
}

</mosaic_0001>

<bundles_post_ra>
// kernel: _decode_impl.1
= control target key start
LH: loop header
LB: loop body
LE: loop exit
PB: predicated region body
PF: predicated region fallthrough
CT: control target
= control target key end

     0   :  { %s805_s0 = inlined_call_operand.<no memory space> [shape: f32[1,1], index: 0, kind: input, shape index: {}]   ;;  %s806_s1 = inlined_call_operand.vmem [shape: f32[2,4,256], index: 1, kind: input, shape index: {}]   ;;  %s807_s2 = inlined_call_operand.vmem [shape: f32[8,4], index: 2, kind: input, shape index: {}]   ;;  %s808_s3 = inlined_call_operand.vmem [shape: f32[8,1], index: 3, kind: input, shape index: {}]   ;;  %s809_s4 = inlined_call_operand.hbm [shape: f32[2,8,256], index: 4, kind: output, shape index: {}]  }
   0x1   :  { %9 = sst [smem:[#allocation2]] %s805_s0 }
   0x2   :  { %10 = vsyncpa [#allocation4], 0 }
   0x3   :  { %12 = vsyncpa [#allocation4 + $0x1], 0  ;;  %s673_s17 = smov 0   ;;  %s675_s18 = smov 0  }
   0x4   :  { %s677_s19 = smov 0   ;;  %s679_s20 = smov 0  }
   0x5   :  { %s681_s21 = smov 0   ;;  %s683_s22 = smov 0  }
   0x6 LB: > { %s480_s0 = sadd.s32 4294967295, %s641_s22   ;;  %s481_s23 = sadd.s32 4294967294, %s641_s22   ;;  %s641_s22 = sphi %s683_s22, %s18_s22   ;;  %s637_s21 = sphi %s681_s21, %s818_s21   ;;  %s633_s20 = sphi %s679_s20, %s817_s20   ;;  %s629_s19 = sphi %s677_s19, %s816_s19   ;;  %s625_s18 = sphi %s675_s18, %s815_s18   ;;  %s621_s17 = sphi %s673_s17, %s814_s17  }
   0x7   : > { %s30_s24 = sadd.s32 1, %s637_s21  ;;  %s130_s25 = sadd.s32 1, %s629_s19 }
   0x8   : > { %p32_p0 = scmp.ge.s32.totalorder %s30_s24, 2  ;;  %p140_p1 = scmp.ne.s32.totalorder %s629_s19, %s625_s18 }
   0x9   : > { %p141_p2 = scmp.eq.s32.totalorder %s480_s0, 1  ;;  %p146_p3 = scmp.ne.s32.totalorder %s625_s18, %s621_s17 }
   0xa   : > { %s820_s24 = smov (%p32_p0, %s30_s24), 0  ;;  %p147_p5 = scmp.eq.s32.totalorder %s481_s23, 1 }
   0xb   : > { %p713_p4 = por %p141_p2, %p140_p1  ;;  %s125_s27 = ssub.s32 %s637_s21, %s820_s24 }
   0xc   : > { %p484_p6 = scmp.ge.s32.totalorder %s641_s22, 1  ;;  %p128_p7 = scmp.eq.s32.totalorder %s125_s27, 0 }
   0xd   : > { %p720_p8 = por %p147_p5, %p146_p3  ;;  %p187_p9 = scmp.lt.s32.totalorder %s641_s22, 3 }
   0xe   : > { %s726_s29 = scalar_select %p128_p7, %s629_s19, %s130_s25  }
   0xf   : > { %p188_p10 = pnand %p484_p6, %p187_p9 }
  0x10   : > { %p218_p11 = scmp.lt.s32.totalorder (!%p188_p10), %s633_s20, 1  ;;  %s214_s13 = sand.u32 (!%p188_p10), 1, %s625_s18  }
  0x11   : > { %191 = sbr.rel (%p188_p10) target bundleno = 201 (0xc9), region = 36  ;;  %s485_s14 = sshll.u32 (!%p188_p10), %s214_s13, 4 }
  0x12   : > { %s746_s15 = scalar_lea.vmem (!%p188_p10), [#allocation3], %s485_s14  ;;  %s341_s16 = sld [smem:[#allocation2]] (!%p188_p10) }
  0x13   : > { %s504_s0 = sshll.u32 (!%p188_p10), %s633_s20, 4  ;;  %s386_s5 = scalar_lea.sflag (!%p188_p10), [#allocation4], %s214_s13 }
  0x14   : > { %s399_s27 = scalar_lea.hbm (!%p188_p10), %s809_s4, %s504_s0 }
  0x15   : > { %s403_s30 = sshll.u32 (!%p188_p10), %s399_s27, 4  ;;  %s404_s30 = int_to_ptr.hbm [resolvable:$true] %s403_s30 }
  0x16   : > { %v230_v0 = vld [vmem:[%s808_s3] sm:$0xff]  ;;  %v643_v1 = vmov 0   ;;  %s219_s6 = scalar_select %p218_p11, %s633_s20, 1  ;;  %vm244_vm0 = vcmask 1043456   ;;  %vm240_vm1 = vcmask 31744   ;;  %v306_v6 = vlaneseq }
  0x17   : > { %562 = vset.pattern.permute.xlu0 %v643_v1  ;;  %v229_v3 = vld [vmem:[%s807_s2] sm:$0xff]  ;;  %v644_v8 = vmov 0.0   ;;  %vm291_vm3 = vcmask 1047557   ;;  %s401_s20 = sshll.u32 %s746_s15, 4  ;;  %vm366_vm15 = vcmask 1040384   ;;  %s402_s20 = int_to_ptr.vmem [resolvable:$true] %s401_s20 }
  0x18   : > { %233 = vperm.xlu0 %562, %v230_v0   ;;  %s503_s7 = sshll.u32 %s219_s6, 3  ;;  %vm742_vm2 = vcmp.lt.s32.totalorder %v306_v6, 256  ;;  %v307_v22 = vshrl.u32 %v306_v6, 7  ;;  %v342_v38 = vstv %s341_s16  ;;  %s577_s6 = sshra.s32 %s404_s30, 4  ;;  %s578_s6 = int_to_ptr.hbm [resolvable:$true] %s577_s6 }
  0x19   : > { %s225_s10 = scalar_lea.vmem %s806_s1, %s503_s7  ;;  %497 = vst.msk [vmem:[%s746_s15 + $0x7] ss:$8 sm:$0x3] %vm742_vm2, %v644_v8  ;;  %s579_s7 = scalar_lea.hbm %s578_s6, 16 }
  0x1a   : > { %v228_v2 = vld [vmem:[%s225_s10] sm:$0xff]  ;;  %v310_v27 = vrot.slane %v307_v22, 3  ;;  %p580_p12 = scmp.ne.s32.totalorder %s578_s6, %s579_s7  ;;  %s583_s10 = scalar_lea.hbm %s809_s4, 32 }
  0x1b   : > { %237 = vst [vmem:[#allocation1] ss:$2 sm:$0xff] %v228_v2  ;;  %p584_p1 = scmp.lt.s32.totalorder %s578_s6, %s809_s4  ;;  %p585_p2 = scmp.lt.s32.totalorder %s583_s10, %s579_s7 }
  0x1c   : > { %p581_p13 = pnand %p580_p12, %p713_p4 }
  0x1d   : > { %p586_p3 = por %p585_p2, %p584_p1 }
  0x1e   : > { %p582_p0 = pneg %p581_p13 }
  0x20   : > { %p587_p5 = pnand %p586_p3, %p582_p0 }
  0x22   : > { %v238_v4 = vld.sshfl [vmem:[#allocation1] sm:$0xff pattern:$0x75316420]  ;;  %v239_v5 = vld.sshfl [vmem:[#allocation1 + $0x8] sm:$0xff pattern:$0x75316420] }
  0x23   : > { %488 = vmatpush.msk.msra.mxu0 %vm244_vm0, %v238_v4  ;;  %490 = vmatpush.msk.msra.mxu1 %vm244_vm0, %v239_v5 }
  0x24   : > { %489 = vmatmul.msk.f32.vlgmr.msra.gmra.mxu0 %vm240_vm1, %v229_v3  ;;  %491 = vmatmul.msk.f32.vlgmr.msra.gmra.mxu1 %vm240_vm1, %v229_v3 }
  0x8a   : > { %v234_v9 = vpop.permute.xlu0 %233 }
  0xa1   : > { %v266_v10 = vpop.f32.mrf.mxu0  ;;  %v286_v11 = vpop.f32.mrf.mxu1 }
  0xa2   : > { %v267_v12 = vadd.f32 %v266_v10, %v234_v9  ;;  %v287_v13 = vadd.f32 %v286_v11, %v234_v9 }
  0xa4   : > { %289 = vst [vmem:[%s746_s15] sm:$0xf] %v267_v12  ;;  %v292_v14 = vsel %vm291_vm3, %v267_v12, -inf  ;;  %v299_v15 = vsel %vm291_vm3, %v287_v13, -inf }
  0xa5   : > { %v293_v16 = vrot.slane %v292_v14, 4  ;;  %290 = vst [vmem:[%s746_s15 + $0x8] sm:$0xf] %v287_v13  ;;  %v300_v17 = vrot.slane %v299_v15, 4 }
  0xa7   : > { %v294_v18 = vmax.f32 %v292_v14, %v293_v16  ;;  %v301_v19 = vmax.f32 %v299_v15, %v300_v17 }
  0xa9   : > { %v295_v20 = vrot.slane %v294_v18, 2  ;;  %v302_v21 = vrot.slane %v301_v19, 2 }
  0xab   : > { %v296_v23 = vmax.f32 %v294_v18, %v295_v20  ;;  %v303_v24 = vmax.f32 %v301_v19, %v302_v21 }
  0xad   : > { %v297_v25 = vrot.slane %v296_v23, 1  ;;  %v304_v26 = vrot.slane %v303_v24, 1 }
  0xaf   : > { %v298_v28 = vmax.f32 %v296_v23, %v297_v25  ;;  %v305_v29 = vmax.f32 %v303_v24, %v304_v26 }
  0xb1   : > { %vm308_vm4 = vcmp.eq.f32.partialorder %v267_v12, %v298_v28  ;;  %v339_v30 = vmul.f32 %v298_v28, %v267_v12  ;;  %vm309_vm5 = vcmp.eq.f32.partialorder %v287_v13, %v305_v29  ;;  %v340_v33 = vmul.f32 %v305_v29, %v287_v13 }
  0xb2   : > { %v311_v31 = vsel %vm308_vm4, %v310_v27, 3  ;;  %v312_v32 = vsel %vm309_vm5, %v310_v27, 3  ;;  %vm336_vm14 = vcmp.gt.f32.partialorder %v305_v29, -inf  ;;  %vm335_vm0 = vcmp.gt.f32.partialorder %v298_v28, -inf }
  0xb3   : > { %v313_v34 = vsel %vm291_vm3, %v311_v31, 2147483647  ;;  %351 = vst [vmem:[#allocation1] sm:$0xff] %v339_v30  ;;  %v323_v35 = vsel %vm291_vm3, %v312_v32, 2147483647  ;;  %vm343_vm8 = vcmp.gt.f32.partialorder %v339_v30, %v342_v38  ;;  %vm344_vm9 = vcmp.gt.f32.partialorder %v340_v33, %v342_v38 }
  0xb4   : > { %v314_v36 = vrot.slane %v313_v34, 4  ;;  %v324_v37 = vrot.slane %v323_v35, 4  ;;  %352 = vst [vmem:[#allocation1 + $0x9] sm:$0xff] %v340_v33  ;;  %v492_v44 = vsel %vm343_vm8, 1.0, %v644_v8  ;;  %v493_v49 = vsel %vm344_vm9, 1.0, %v644_v8 }
  0xb6   : > { %vm315_vm6 = vcmp.lt.s32.totalorder %v313_v34, %v314_v36  ;;  %vm325_vm7 = vcmp.lt.s32.totalorder %v323_v35, %v324_v37 }
  0xb7   : > { %v316_v39 = vsel %vm315_vm6, %v313_v34, %v314_v36  ;;  %v326_v40 = vsel %vm325_vm7, %v323_v35, %v324_v37 }
  0xb8   : > { %v317_v41 = vrot.slane %v316_v39, 2  ;;  %v327_v42 = vrot.slane %v326_v40, 2 }
  0xba   : > { %vm318_vm10 = vcmp.lt.s32.totalorder %v316_v39, %v317_v41  ;;  %vm328_vm11 = vcmp.lt.s32.totalorder %v326_v40, %v327_v42 }
  0xbb   : > { %v319_v43 = vsel %vm318_vm10, %v316_v39, %v317_v41  ;;  %v329_v45 = vsel %vm328_vm11, %v326_v40, %v327_v42  ;;  %v354_v46 = vld [vmem:[#allocation1 + $0x4] ss:$9 sm:$0xff] }
  0xbc   : > { %v320_v47 = vrot.slane %v319_v43, 1  ;;  %v330_v48 = vrot.slane %v329_v45, 1  ;;  %374 = vst [vmem:[#allocation1] sm:$0xff] %v492_v44 }
  0xbd   : > { %375 = vst [vmem:[#allocation1 + $0x9] sm:$0xff] %v493_v49 }
  0xbe   : > { %vm321_vm12 = vcmp.lt.s32.totalorder %v319_v43, %v320_v47  ;;  %vm331_vm13 = vcmp.lt.s32.totalorder %v329_v45, %v330_v48  ;;  %494 = vst.msk [vmem:[%s746_s15 + $0x4] ss:$8 sm:$0x3] %vm742_vm2, %v354_v46 }
  0xbf   : > { %v322_v50 = vsel %vm321_vm12, %v319_v43, %v320_v47  ;;  %v332_v51 = vsel %vm331_vm13, %v329_v45, %v330_v48 }
  0xc0   : > { %v333_v52 = vcvt.s32.f32 %v322_v50  ;;  %v334_v53 = vcvt.s32.f32 %v332_v51 }
  0xc2   : > { %v338_v54 = vsel %vm336_vm14, %v334_v53, 0.0  ;;  %v337_v56 = vsel %vm335_vm0, %v333_v52, 0.0 }
  0xc3   : > { %v365_v55 = vrot.slane %v338_v54, 7 }
  0xc4   : > { %v377_v57 = vld [vmem:[#allocation1 + $0x4] ss:$9 sm:$0xff] }
  0xc5   : > { %v367_v58 = vsel %vm366_vm15, %v337_v56, %v365_v55  ;;  %496 = vst.msk [vmem:[%s746_s15 + $0x6] ss:$8 sm:$0x3] %vm742_vm2, %v377_v57 }
  0xc6   : > { %495 = vst.msk [vmem:[%s746_s15 + $0x5] ss:$8 sm:$0x3] %vm742_vm2, %v367_v58 }
  0xc7   : > { %590 = shalt.err (!%p587_p5)
}
  0xc8   : > { %505 = dma.vmem_to_hbm [thread:$0]  (%p713_p4), %s402_s20, 256, %s404_s30, %s386_s5  }
  0xc9 PF: > { %p511_p6 = scmp.ge.s32.totalorder %s641_s22, 2  ;;  %s415_s13 = sand.u32 1, %s621_s17  }
  0xca   : > { %s416_s14 = scalar_lea.sflag [#allocation4], %s415_s13 }
  0xcb   : > { %p508_p7 = pnand %p511_p6, %p720_p8 }
  0xcd   : > { %p509_p9 = pneg %p508_p7 }
  0xcf   : > { %616 = dma.done.wait (%p509_p9), %s416_s14, 256  }
  0xd0   : > { %618 = vsyncadd (%p509_p9), %s416_s14, 4294967040  ;;  %s18_s22 = sadd.s32 1, %s641_s22   ;;  %s814_s17 = smov %s625_s18 }
  0xd1   : > { %p15_p10 = scmp.ge.s32.totalorder %s18_s22, 4   ;;  %s815_s18 = smov %s629_s19 }
  0xd2   : > { %s816_s19 = smov %s726_s29  ;;  %s817_s20 = smov %s637_s21 }
  0xd3   : > { %s818_s21 = smov %s820_s24  ;;  %17 = sbr.rel (!%p15_p10) target bundleno = 6 (0x6), region = 77 }
  0xd8   :  { %422 = vsyncpa [#allocation4], 1 }
  0xd9   :  { %424 = vsyncpa [#allocation4 + $0x1], 1 }

</bundles_post_ra>
